<compile_context>
chip_gen: v6e
topology: v6e:2x2x1
jax: 0.10.0
libtpu: 0.0.40
codegen_flags: <defaults>
</compile_context>

<pallas_src>
import functools

import jax
import jax.numpy as jnp
from jax.experimental import pallas as pl
from jax.experimental.pallas import tpu as pltpu


def _w2v_kernel(ids0_ref, ids1_ref, ids2_ref,        # scalar prefetch (SMEM)
                emb_hbm, emb_w_hbm,                   # embedding tables (HBM)
                true_b_ref, neg_b_ref,                # gathered biases (VMEM)
                out_ref,                              # [BT, OUT_W] combined output
                ie_buf, tw_buf, nw_buf, sem,          # scratch
                *, BT, NEG, D, OUT_W):
    base = pl.program_id(0) * BT

    # ---- in-kernel embedding-row gather: HBM -> VMEM, one DMA per row ----
    @pl.loop(0, BT)
    def _(b):
        gb = base + b
        pltpu.make_async_copy(emb_hbm.at[ids0_ref[gb]], ie_buf.at[b], sem).start()
        pltpu.make_async_copy(emb_w_hbm.at[ids1_ref[gb]], tw_buf.at[b], sem).start()

        @pl.loop(0, NEG)
        def _(k):
            pltpu.make_async_copy(
                emb_w_hbm.at[ids2_ref[gb, k]], nw_buf.at[b, k], sem).start()

    # Wait for every issued copy (all copies are identical D-float rows).
    @pl.loop(0, BT * (NEG + 2))
    def _(i):
        pltpu.make_async_copy(emb_w_hbm.at[0], nw_buf.at[0, 0], sem).wait()

    # ---- compute: VPU broadcast-multiply + reduce (MXU useless at 1xDxNEG) ----
    ie = ie_buf[...]                                   # [BT, D]
    tw = tw_buf[...]                                   # [BT, D]
    nw = nw_buf[...]                                   # [BT, NEG, D]

    true_col = jnp.sum(ie * tw, axis=1, keepdims=True) + true_b_ref[...]     # [BT, 1]
    # neg[b, j] = sum_k ie[b, k] * nw[b, k, j]   (requires NEG == D, as in torch)
    neg = jnp.sum(ie[:, :, None] * nw, axis=1) + neg_b_ref[...]              # [BT, NEG]

    # Lane-dense combined output: one full-width [BT, OUT_W] store.
    pad = jnp.zeros((BT, OUT_W - 1 - NEG), jnp.float32)
    out_ref[...] = jnp.concatenate([true_col, neg, pad], axis=1)


def word2vec_forward(emb_table, emb_w_table, emb_b_table,
                     inputs0, inputs1, inputs2, neg_num):
    B = inputs0.shape[0]
    D = emb_table.shape[1]
    NEG = neg_num
    # torch.matmul([B,1,D],[B,NEG,D]) is only shape-valid when NEG == D.
    assert NEG == D, "Word2VecLayer forward requires neg_num == emb_dim"

    ids0 = inputs0.reshape(B).astype(jnp.int32)
    ids1 = inputs1.reshape(B).astype(jnp.int32)
    ids2 = inputs2.reshape(B, NEG).astype(jnp.int32)

    # Tiny bias gathers stay in XLA; only the bias add is fused in-kernel.
    true_b = jnp.take(emb_b_table, ids1, axis=0).reshape(B, 1)
    neg_b = jnp.take(emb_b_table, ids2.reshape(-1), axis=0).reshape(B, NEG)

    BT = 8 if B % 8 == 0 else B             # batch tile (multiple of 8 when possible)
    grid = (B // BT,)
    OUT_W = 128 * pl.cdiv(1 + NEG, 128)     # lane-dense combined output width

    kernel = functools.partial(_w2v_kernel, BT=BT, NEG=NEG, D=D, OUT_W=OUT_W)

    out = pl.pallas_call(
        kernel,
        out_shape=jax.ShapeDtypeStruct((B, OUT_W), jnp.float32),
        grid_spec=pltpu.PrefetchScalarGridSpec(
            num_scalar_prefetch=3,
            grid=grid,
            in_specs=[
                pl.BlockSpec(memory_space=pl.ANY),                       # emb table (HBM)
                pl.BlockSpec(memory_space=pl.ANY),                       # emb_w table (HBM)
                pl.BlockSpec((BT, 1), lambda i, i0, i1, i2: (i, 0)),     # true bias
                pl.BlockSpec((BT, NEG), lambda i, i0, i1, i2: (i, 0)),   # neg bias
            ],
            out_specs=pl.BlockSpec((BT, OUT_W), lambda i, i0, i1, i2: (i, 0)),
            scratch_shapes=[
                pltpu.VMEM((BT, D), jnp.float32),        # input_emb rows
                pltpu.VMEM((BT, D), jnp.float32),        # true_emb_w rows
                pltpu.VMEM((BT, NEG, D), jnp.float32),   # neg_emb_w rows
                pltpu.SemaphoreType.DMA,                 # shared gather semaphore
            ],
        ),
        compiler_params=pltpu.CompilerParams(
            dimension_semantics=("parallel",),
            vmem_limit_bytes=32 * 1024 * 1024,
        ),
        cost_estimate=pl.CostEstimate(
            flops=2 * B * D * (NEG + 1),
            transcendentals=0,
            bytes_accessed=4 * (B * D * (NEG + 2) + B * (NEG + 1) + B * OUT_W),
        ),
    )(ids0, ids1, ids2, emb_table, emb_w_table, true_b, neg_b)

    true_logits = out[:, 0:1]
    neg_logits = out[:, 1:1 + NEG]
    return true_logits, neg_logits


def _reference_forward(emb_table, emb_w_table, emb_b_table,
                       inputs0, inputs1, inputs2, neg_num):
    """Plain-JAX transcription of the torch forward (for verification)."""
    input_emb = jnp.squeeze(emb_table[inputs0], axis=1)
    true_emb_w = jnp.squeeze(emb_w_table[inputs1], axis=1)
    true_emb_b = jnp.squeeze(emb_b_table[inputs1], axis=1)
    neg_emb_w = emb_w_table[inputs2]                         # [B, NEG, D]
    neg_emb_b_vec = emb_b_table[inputs2].reshape(-1, neg_num)
    true_logits = jnp.sum(input_emb * true_emb_w, axis=1, keepdims=True) + true_emb_b
    input_emb_re = input_emb.reshape(-1, 1, input_emb.shape[1])
    neg_matmul = jnp.matmul(input_emb_re, neg_emb_w)         # requires NEG == D
    neg_matmul = jnp.swapaxes(neg_matmul, 1, 2)
    neg_matmul_re = neg_matmul.reshape(-1, neg_num)
    neg_logits = neg_matmul_re + neg_emb_b_vec
    return true_logits, neg_logits


if __name__ == "__main__":
    SPARSE_FEATURE_NUMBER = 100
    EMB_DIM = 32
    NEG_NUM = 32          # the torch matmul as written is only valid when NEG_NUM == EMB_DIM
    B = 8

    key = jax.random.PRNGKey(0)
    k_emb, k_w, k_b, k0, k1, k2 = jax.random.split(key, 6)

    # nn.Embedding default init: N(0, 1)
    emb_table = jax.random.normal(k_emb, (SPARSE_FEATURE_NUMBER, EMB_DIM), jnp.float32)
    emb_w_table = jax.random.normal(k_w, (SPARSE_FEATURE_NUMBER, EMB_DIM), jnp.float32)
    emb_b_table = jax.random.normal(k_b, (SPARSE_FEATURE_NUMBER, 1), jnp.float32)

    inputs0 = jax.random.randint(k0, (B, 1), 0, SPARSE_FEATURE_NUMBER, jnp.int32)
    inputs1 = jax.random.randint(k1, (B, 1), 0, SPARSE_FEATURE_NUMBER, jnp.int32)
    inputs2 = jax.random.randint(k2, (B, NEG_NUM), 0, SPARSE_FEATURE_NUMBER, jnp.int32)

    true_logits, neg_logits = word2vec_forward(
        emb_table, emb_w_table, emb_b_table, inputs0, inputs1, inputs2, NEG_NUM)
    jax.block_until_ready((true_logits, neg_logits))

    ref_true, ref_neg = _reference_forward(
        emb_table, emb_w_table, emb_b_table, inputs0, inputs1, inputs2, NEG_NUM)

    assert true_logits.shape == (B, 1) and neg_logits.shape == (B, NEG_NUM)
    assert jnp.allclose(true_logits, ref_true, atol=1e-4, rtol=1e-4)
    assert jnp.allclose(neg_logits, ref_neg, atol=1e-4, rtol=1e-4)

    print("KERNEL_OK")
</pallas_src>

<mosaic_0001>
module attributes {stable_mosaic.version = 11 : i64} {
  func.func @_w2v_kernel(%arg0: i32, %arg1: memref<8xi32, #tpu.memory_space<smem>>, %arg2: memref<8xi32, #tpu.memory_space<smem>>, %arg3: memref<8x32xi32, #tpu.memory_space<smem>>, %arg4: memref<100x32xf32, #tpu.memory_space<any>>, %arg5: memref<100x32xf32, #tpu.memory_space<any>>, %arg6: memref<8x1xf32, #tpu.memory_space<vmem>>, %arg7: memref<8x32xf32, #tpu.memory_space<vmem>>, %arg8: memref<8x128xf32, #tpu.memory_space<vmem>>, %arg9: memref<8x32xf32, #tpu.memory_space<vmem>>, %arg10: memref<8x32xf32, #tpu.memory_space<vmem>>, %arg11: memref<8x32x32xf32, #tpu.memory_space<vmem>>, %arg12: memref<!tpu.dma_semaphore, #tpu.memory_space<semaphore_mem>>) attributes {dimension_semantics = [#tpu.dimension_semantics<parallel>], iteration_bounds = array<i64: 1>, scalar_prefetch = 3 : i64, scratch_operands = 4 : i64, tpu.core_type = #tpu.core_type<tc>, window_params = [{}, {}, {transform_indices = @transform_2, window_bounds = array<i64: 8, 1>}, {transform_indices = @transform_3, window_bounds = array<i64: 8, 32>}, {transform_indices = @transform_4, window_bounds = array<i64: 8, 128>}]} {
    %c8_i32 = arith.constant 8 : i32
    %0 = arith.muli %arg0, %c8_i32 : i32
    %c0_i32 = arith.constant 0 : i32
    %c8_i32_0 = arith.constant 8 : i32
    %1 = arith.addi %c0_i32, %c8_i32_0 : i32
    %c1_i32 = arith.constant 1 : i32
    scf.for %arg13 = %c0_i32 to %1 step %c1_i32  : i32 {
      %c1_i32_18 = arith.constant 1 : i32
      %20 = arith.muli %arg13, %c1_i32_18 : i32
      %c0_i32_19 = arith.constant 0 : i32
      %21 = arith.addi %c0_i32_19, %20 : i32
      %22 = arith.addi %0, %21 : i32
      %23 = arith.index_cast %22 : i32 to index
      %24 = memref.load %arg1[%23] : memref<8xi32, #tpu.memory_space<smem>>
      %c0_i32_20 = arith.constant 0 : i32
      %25 = tpu.memref_slice %arg4[%24, %c0_i32_20] : memref<100x32xf32, #tpu.memory_space<any>> -> memref<1x32xf32, #tpu.memory_space<any>>
      %26 = tpu.memref_squeeze %25 : memref<1x32xf32, #tpu.memory_space<any>> -> memref<32xf32, #tpu.memory_space<any>>
      %c0_i32_21 = arith.constant 0 : i32
      %27 = tpu.memref_slice %arg9[%21, %c0_i32_21] : memref<8x32xf32, #tpu.memory_space<vmem>> -> memref<1x32xf32, #tpu.memory_space<vmem>>
      %28 = tpu.memref_squeeze %27 : memref<1x32xf32, #tpu.memory_space<vmem>> -> memref<32xf32, #tpu.memory_space<vmem>>
      tpu.enqueue_dma source(%26 : memref<32xf32, #tpu.memory_space<any>>) target(%28 : memref<32xf32, #tpu.memory_space<vmem>>) target_semaphore(%arg12 : memref<!tpu.dma_semaphore, #tpu.memory_space<semaphore_mem>>)
      %29 = arith.index_cast %22 : i32 to index
      %30 = memref.load %arg2[%29] : memref<8xi32, #tpu.memory_space<smem>>
      %c0_i32_22 = arith.constant 0 : i32
      %31 = tpu.memref_slice %arg5[%30, %c0_i32_22] : memref<100x32xf32, #tpu.memory_space<any>> -> memref<1x32xf32, #tpu.memory_space<any>>
      %32 = tpu.memref_squeeze %31 : memref<1x32xf32, #tpu.memory_space<any>> -> memref<32xf32, #tpu.memory_space<any>>
      %c0_i32_23 = arith.constant 0 : i32
      %33 = tpu.memref_slice %arg10[%21, %c0_i32_23] : memref<8x32xf32, #tpu.memory_space<vmem>> -> memref<1x32xf32, #tpu.memory_space<vmem>>
      %34 = tpu.memref_squeeze %33 : memref<1x32xf32, #tpu.memory_space<vmem>> -> memref<32xf32, #tpu.memory_space<vmem>>
      tpu.enqueue_dma source(%32 : memref<32xf32, #tpu.memory_space<any>>) target(%34 : memref<32xf32, #tpu.memory_space<vmem>>) target_semaphore(%arg12 : memref<!tpu.dma_semaphore, #tpu.memory_space<semaphore_mem>>)
      %c0_i32_24 = arith.constant 0 : i32
      %c32_i32 = arith.constant 32 : i32
      %35 = arith.addi %c0_i32_24, %c32_i32 : i32
      %c1_i32_25 = arith.constant 1 : i32
      scf.for %arg14 = %c0_i32_24 to %35 step %c1_i32_25  : i32 {
        %c1_i32_27 = arith.constant 1 : i32
        %36 = arith.muli %arg14, %c1_i32_27 : i32
        %c0_i32_28 = arith.constant 0 : i32
        %37 = arith.addi %c0_i32_28, %36 : i32
        %38 = arith.index_cast %22 : i32 to index
        %39 = arith.index_cast %37 : i32 to index
        %40 = memref.load %arg3[%38, %39] : memref<8x32xi32, #tpu.memory_space<smem>>
        %c0_i32_29 = arith.constant 0 : i32
        %41 = tpu.memref_slice %arg5[%40, %c0_i32_29] : memref<100x32xf32, #tpu.memory_space<any>> -> memref<1x32xf32, #tpu.memory_space<any>>
        %42 = tpu.memref_squeeze %41 : memref<1x32xf32, #tpu.memory_space<any>> -> memref<32xf32, #tpu.memory_space<any>>
        %c0_i32_30 = arith.constant 0 : i32
        %43 = tpu.memref_slice %arg11[%21, %37, %c0_i32_30] : memref<8x32x32xf32, #tpu.memory_space<vmem>> -> memref<1x1x32xf32, #tpu.memory_space<vmem>>
        %44 = tpu.memref_squeeze %43 : memref<1x1x32xf32, #tpu.memory_space<vmem>> -> memref<32xf32, #tpu.memory_space<vmem>>
        tpu.enqueue_dma source(%42 : memref<32xf32, #tpu.memory_space<any>>) target(%44 : memref<32xf32, #tpu.memory_space<vmem>>) target_semaphore(%arg12 : memref<!tpu.dma_semaphore, #tpu.memory_space<semaphore_mem>>)
      }
      %c32_i32_26 = arith.constant 32 : i32
    }
    %c8_i32_1 = arith.constant 8 : i32
    %c0_i32_2 = arith.constant 0 : i32
    %c272_i32 = arith.constant 272 : i32
    %2 = arith.addi %c0_i32_2, %c272_i32 : i32
    %c1_i32_3 = arith.constant 1 : i32
    scf.for %arg13 = %c0_i32_2 to %2 step %c1_i32_3  : i32 {
      %c0_i32_18 = arith.constant 0 : i32
      %c0_i32_19 = arith.constant 0 : i32
      %c0_i32_20 = arith.constant 0 : i32
      %c0_i32_21 = arith.constant 0 : i32
      %20 = tpu.memref_slice %arg5[%c0_i32_18, %c0_i32_21] : memref<100x32xf32, #tpu.memory_space<any>> -> memref<1x32xf32, #tpu.memory_space<any>>
      %21 = tpu.memref_squeeze %20 : memref<1x32xf32, #tpu.memory_space<any>> -> memref<32xf32, #tpu.memory_space<any>>
      %c0_i32_22 = arith.constant 0 : i32
      %22 = tpu.memref_slice %arg11[%c0_i32_19, %c0_i32_20, %c0_i32_22] : memref<8x32x32xf32, #tpu.memory_space<vmem>> -> memref<1x1x32xf32, #tpu.memory_space<vmem>>
      %23 = tpu.memref_squeeze %22 : memref<1x1x32xf32, #tpu.memory_space<vmem>> -> memref<32xf32, #tpu.memory_space<vmem>>
      tpu.wait_dma2 semaphore(%arg12 : memref<!tpu.dma_semaphore, #tpu.memory_space<semaphore_mem>>) src(%21 : memref<32xf32, #tpu.memory_space<any>>) dst(%23 : memref<32xf32, #tpu.memory_space<vmem>>)
    }
    %c0 = arith.constant 0 : index
    %c0_4 = arith.constant 0 : index
    %3 = vector.load %arg9[%c0, %c0_4] : memref<8x32xf32, #tpu.memory_space<vmem>>, vector<8x32xf32>
    %c0_5 = arith.constant 0 : index
    %c0_6 = arith.constant 0 : index
    %4 = vector.load %arg10[%c0_5, %c0_6] : memref<8x32xf32, #tpu.memory_space<vmem>>, vector<8x32xf32>
    %c0_7 = arith.constant 0 : index
    %c0_8 = arith.constant 0 : index
    %c0_9 = arith.constant 0 : index
    %5 = vector.load %arg11[%c0_7, %c0_8, %c0_9] : memref<8x32x32xf32, #tpu.memory_space<vmem>>, vector<8x32x32xf32>
    %6 = arith.mulf %3, %4 : vector<8x32xf32>
    %cst = arith.constant dense<0.000000e+00> : vector<8xf32>
    %7 = vector.multi_reduction <add>, %6, %cst [1] : vector<8x32xf32> to vector<8xf32>
    %8 = vector.shape_cast %7 : vector<8xf32> to vector<8x1xf32>
    %c0_10 = arith.constant 0 : index
    %c0_11 = arith.constant 0 : index
    %9 = vector.load %arg6[%c0_10, %c0_11] : memref<8x1xf32, #tpu.memory_space<vmem>>, vector<8x1xf32>
    %10 = arith.addf %8, %9 : vector<8x1xf32>
    %11 = vector.shape_cast %3 : vector<8x32xf32> to vector<8x32x1xf32>
    %12 = vector.broadcast %11 : vector<8x32x1xf32> to vector<8x32x32xf32>
    %13 = arith.mulf %12, %5 : vector<8x32x32xf32>
    %cst_12 = arith.constant dense<0.000000e+00> : vector<8x32xf32>
    %14 = vector.multi_reduction <add>, %13, %cst_12 [1] : vector<8x32x32xf32> to vector<8x32xf32>
    %c0_13 = arith.constant 0 : index
    %c0_14 = arith.constant 0 : index
    %15 = vector.load %arg7[%c0_13, %c0_14] : memref<8x32xf32, #tpu.memory_space<vmem>>, vector<8x32xf32>
    %16 = arith.addf %14, %15 : vector<8x32xf32>
    %cst_15 = arith.constant 0.000000e+00 : f32
    %17 = vector.broadcast %cst_15 : f32 to vector<8x95xf32>
    %18 = tpu.concatenate %10, %16, %17 in 1 : vector<8x1xf32>, vector<8x32xf32>, vector<8x95xf32> -> vector<8x128xf32>
    %c0_16 = arith.constant 0 : index
    %c0_17 = arith.constant 0 : index
    %19 = vector.load %arg8[%c0_16, %c0_17] : memref<8x128xf32, #tpu.memory_space<vmem>>, vector<8x128xf32>
    tpu.vector_store %arg8[%c0_16, %c0_17], %18 {strides = array<i32>} : memref<8x128xf32, #tpu.memory_space<vmem>>, vector<8x128xf32>,
    return
  }
  func.func @transform_2(%arg0: i32, %arg1: memref<8xi32, #tpu.memory_space<smem>>, %arg2: memref<8xi32, #tpu.memory_space<smem>>, %arg3: memref<8x32xi32, #tpu.memory_space<smem>>) -> (i32, i32) {
    %c0_i32 = arith.constant 0 : i32
    %c0_i32_0 = arith.constant 0 : i32
    return %arg0, %c0_i32 : i32, i32
  }
  func.func @transform_3(%arg0: i32, %arg1: memref<8xi32, #tpu.memory_space<smem>>, %arg2: memref<8xi32, #tpu.memory_space<smem>>, %arg3: memref<8x32xi32, #tpu.memory_space<smem>>) -> (i32, i32) {
    %c0_i32 = arith.constant 0 : i32
    %c0_i32_0 = arith.constant 0 : i32
    return %arg0, %c0_i32 : i32, i32
  }
  func.func @transform_4(%arg0: i32, %arg1: memref<8xi32, #tpu.memory_space<smem>>, %arg2: memref<8xi32, #tpu.memory_space<smem>>, %arg3: memref<8x32xi32, #tpu.memory_space<smem>>) -> (i32, i32) {
    %c0_i32 = arith.constant 0 : i32
    %c0_i32_0 = arith.constant 0 : i32
    return %arg0, %c0_i32 : i32, i32
  }
}

</mosaic_0001>

<bundles_post_ra>
// kernel: tpu_custom_call.1
= control target key start
LH: loop header
LB: loop body
LE: loop exit
PB: predicated region body
PF: predicated region fallthrough
CT: control target
= control target key end

     0   :  { %s925_s0 = inlined_call_operand.vmem [shape: s32[8], index: 0, kind: input, shape index: {}]   ;;  %s926_s3 = inlined_call_operand.vmem [shape: f32[100,32], index: 3, kind: input, shape index: {}]   ;;  %s927_s4 = inlined_call_operand.vmem [shape: f32[100,32], index: 4, kind: input, shape index: {}]   ;;  %s928_s5 = inlined_call_operand.vmem [shape: f32[8,1], index: 5, kind: input, shape index: {}]   ;;  %s929_s6 = inlined_call_operand.vmem [shape: f32[8,32], index: 6, kind: input, shape index: {}]   ;;  %s930_s7 = inlined_call_operand.hbm [shape: f32[8,128], index: 7, kind: output, shape index: {}]   ;;  %s931_s1 = inlined_call_operand.vmem [shape: s32[8], index: 1, kind: input, shape index: {}]   ;;  %s932_s2 = inlined_call_operand.vmem [shape: s32[8,32], index: 2, kind: input, shape index: {}]  }
   0x1   :  { %s12_s26 = sshll.u32 %s925_s0, 4  ;;  %s16_s29 = sshll.u32 %s931_s1, 4  ;;  %s13_s26 = int_to_ptr.vmem [resolvable:$true] %s12_s26  ;;  %s17_s29 = int_to_ptr.vmem [resolvable:$true] %s16_s29 }
   0x2   :  { %s705_s30 = scalar_lea.vmem %s13_s26, 16  ;;  %p710_p1 = scmp.lt.s32.totalorder %s13_s26, %s13_s26 }
   0x3   :  { %p706_p0 = scmp.ne.s32.totalorder %s13_s26, %s705_s30  ;;  %p711_p2 = scmp.lt.s32.totalorder %s705_s30, %s705_s30 }
   0x5   :  { %p712_p3 = por %p711_p2, %p710_p1 }
   0x7   :  { %p713_p4 = pnand %p712_p3, %p706_p0 }
   0x9   :  { %716 = shalt.err (!%p713_p4)  }
   0xa   :  { %s791_s8 = smov [#allocation7]   ;;  %s717_s9 = scalar_lea.vmem %s17_s29, 16 }
   0xb   :  { %15 = dma.vmem_to_smem %s13_s26, 16, %s791_s8, [#allocation6] }
   0xc   :  { %p718_p5 = scmp.ne.s32.totalorder %s17_s29, %s717_s9  ;;  %p722_p6 = scmp.lt.s32.totalorder %s17_s29, %s17_s29 }
   0xd   :  { %p723_p7 = scmp.lt.s32.totalorder %s717_s9, %s717_s9 }
   0xf   :  { %p724_p8 = por %p723_p7, %p722_p6 }
  0x11   :  { %p725_p9 = pnand %p724_p8, %p718_p5 }
  0x13   :  { %728 = shalt.err (!%p725_p9)  }
  0x14   :  { %s792_s0 = smov [#allocation8]   ;;  %s20_s11 = sshll.u32 %s932_s2, 4  ;;  %s21_s11 = int_to_ptr.vmem [resolvable:$true] %s20_s11 }
  0x15   :  { %19 = dma.vmem_to_smem %s17_s29, 16, %s792_s0, [#allocation6] }
  0x16   :  { %s729_s12 = scalar_lea.vmem %s21_s11, 128  ;;  %p734_p11 = scmp.lt.s32.totalorder %s21_s11, %s21_s11 }
  0x17   :  { %p730_p10 = scmp.ne.s32.totalorder %s21_s11, %s729_s12  ;;  %p735_p12 = scmp.lt.s32.totalorder %s729_s12, %s729_s12 }
  0x19   :  { %p736_p13 = por %p735_p12, %p734_p11 }
  0x1b   :  { %p737_p0 = pnand %p736_p13, %p730_p10 }
  0x1d   :  { %740 = shalt.err (!%p737_p0)  }
  0x1e   :  { %s793_s13 = smov [#allocation9]  }
  0x1f   :  { %23 = dma.vmem_to_smem %s21_s11, 128, %s793_s13, [#allocation6] }
  0x20   :  { %773 = dma.done.wait [#allocation6], 160 }
  0x21   :  { %774 = vsyncadd [#allocation6], 4294967136 }
  0x22   :  { %25 = sfence }
  0x23   :  { %26 = vsyncpa [#allocation11], 0  ;;  %s845_s14 = smov 0  }
  0x24 LB: > { %s39_s2 = sld [smem:[#allocation7 + %s781_s14]]  ;;  %s41_s18 = scalar_lea.vmem [#allocation2], %s781_s14  ;;  %s781_s14 = sphi %s845_s14, %s37_s14  }
  0x2a   : > { %s40_s17 = scalar_lea.vmem %s926_s3, %s39_s2 }
  0x2b   : > { %v60_v0 = vld [vmem:[%s40_s17] sm:$0x1] }
  0x2c   : > { %61 = vst [vmem:[%s41_s18] sm:$0x1] %v60_v0 }
  0x2d   : > { %87 = vsyncadd [#allocation5], 16  ;;  %s88_s19 = sld [smem:[#allocation8 + %s781_s14]]  ;;  %s90_s23 = scalar_lea.vmem [#allocation3], %s781_s14 }
  0x33   : > { %s89_s22 = scalar_lea.vmem %s927_s4, %s88_s19 }
  0x34   : > { %v109_v1 = vld [vmem:[%s89_s22] sm:$0x1] }
  0x35   : > { %110 = vst [vmem:[%s90_s23] sm:$0x1] %v109_v1 }
  0x36   : > { %136 = vsyncadd [#allocation5], 16  ;;  %s783_s24 = smov 0  }
  0x37 LB: >> { %s143_s25 = sshra.s32 %s785_s24, 7  ;;  %s148_s26 = sand.u32 127, %s785_s24  ;;  %s785_s24 = sphi %s783_s24, %s142_s24  }
  0x38   : >> { %s145_s27 = sadd.s32 %s781_s14, %s143_s25  ;;  %s674_s30 = sshll.u32 %s781_s14, 5 }
  0x39   : >> { %s673_s28 = sshll.u32 %s145_s27, 7  ;;  %s153_s9 = sadd.s32 %s785_s24, %s674_s30 }
  0x3a   : >> { %s149_s29 = sadd.s32 %s673_s28, %s148_s26  ;;  %s154_s11 = scalar_lea.vmem [#allocation4], %s153_s9 }
  0x3b   : >> { %s150_s8 = sld [smem:[#allocation9 + %s149_s29]] }
  0x41   : >> { %s151_s10 = scalar_lea.vmem %s927_s4, %s150_s8 }
  0x42   : >> { %v173_v2 = vld [vmem:[%s151_s10] sm:$0x1] }
  0x43   : >> { %174 = vst [vmem:[%s154_s11] sm:$0x1] %v173_v2 }
  0x44   : >> { %200 = vsyncadd [#allocation5], 16  ;;  %s142_s24 = sadd.s32 1, %s785_s24  }
  0x45   : >> { %p139_p1 = scmp.ge.s32.totalorder %s142_s24, 32  }
  0x46   : > { %s37_s14 = sadd.s32 (%p139_p1), 1, %s781_s14  }
  0x47   : > { %141 = sbr.rel (!%p139_p1) target bundleno = 55 (0x37), region = 175  ;;  %p34_p2 = scmp.ge.s32.totalorder (%p139_p1), %s37_s14, 8  }
  0x4c   :  { %36 = sbr.rel (!%p34_p2) target bundleno = 36 (0x24), region = 186  ;;  %s787_s12 = smov (%p34_p2), 0  }
  0x51 LB: > { %775 = dma.done.wait [#allocation5], 16  ;;  %s789_s12 = sphi %s787_s12, %s206_s12  }
  0x52   : > { %776 = vsyncadd [#allocation5], 4294967280  ;;  %s206_s12 = sadd.s32 1, %s789_s12  }
  0x53   : > { %p203_p3 = scmp.ge.s32.totalorder %s206_s12, 272  }
  0x54   :  { %v250_v3 = vlaneseq (%p203_p3)  ;;  %v209_v5 = vld [vmem:[#allocation2] sm:$0xff] (%p203_p3)  ;;  %v210_v22 = vld [vmem:[#allocation3] sm:$0xff] (%p203_p3)  ;;  %vm244_vm0 = vcmask (%p203_p3), 261120   ;;  %v216_v39 = vld [vmem:[#allocation4 + $0x28] sm:$0xff] (%p203_p3)  ;;  %vm572_vm1 = vcmask (%p203_p3), 1041409   ;;  %vm575_vm2 = vcmask (%p203_p3), 1042434  }
  0x55   :  { %205 = sbr.rel (!%p203_p3) target bundleno = 81 (0x51), region = 197  ;;  %v243_v23 = vmul.f32 (%p203_p3), %v210_v22, %v209_v5  ;;  %v215_v42 = vld [vmem:[#allocation4 + $0x20] sm:$0xff] (%p203_p3)  ;;  %v217_v43 = vld [vmem:[#allocation4 + $0x30] sm:$0xff] (%p203_p3)  ;;  %v212_v45 = vld [vmem:[#allocation4 + $0x8] sm:$0xff] (%p203_p3)  ;;  %vm578_vm3 = vcmask (%p203_p3), 1043459   ;;  %vm581_vm4 = vcmask (%p203_p3), 1044484  }
  0x56   :  { %v251_v4 = vshrl.u32 (%p203_p3), %v250_v3, 7  ;;  %v211_v46 = vld [vmem:[#allocation4] sm:$0xff] (%p203_p3)  ;;  %v220_v47 = vld [vmem:[#allocation4 + $0x48] sm:$0xff] (%p203_p3)  ;;  %v218_v48 = vld [vmem:[#allocation4 + $0x38] sm:$0xff] (%p203_p3)  ;;  %vm584_vm5 = vcmask (%p203_p3), 1045509   ;;  %vm587_vm6 = vcmask (%p203_p3), 1046534  }
  0x57   :  { %v245_v24 = vsel (%p203_p3), %vm244_vm0, %v243_v23, 0.0  ;;  %v213_v51 = vld [vmem:[#allocation4 + $0x10] sm:$0xff] (%p203_p3)  ;;  %v219_v54 = vld [vmem:[#allocation4 + $0x40] sm:$0xff] (%p203_p3)  ;;  %v224_v60 = vld [vmem:[#allocation4 + $0x68] sm:$0xff] (%p203_p3)  ;;  %vm590_vm7 = vcmask (%p203_p3), 1047559   ;;  %vm595_vm8 = vcmask (%p203_p3), 7168  }
  0x58   :  { %v290_v6 = vsub.s32 (%p203_p3), 2, %v251_v4  ;;  %v271_v7 = vsub.s32 (%p203_p3), 1, %v251_v4  ;;  %v252_v10 = vsub.s32 (%p203_p3), 0, %v251_v4  ;;  %v309_v12 = vsub.s32 (%p203_p3), 3, %v251_v4  ;;  %v221_v57 = vld [vmem:[#allocation4 + $0x50] sm:$0xff] (%p203_p3)  ;;  %v222_v63 = vld [vmem:[#allocation4 + $0x58] sm:$0xff] (%p203_p3) }
  0x59   :  { %v328_v14 = vsub.s32 (%p203_p3), 4, %v251_v4  ;;  %v347_v16 = vsub.s32 (%p203_p3), 5, %v251_v4  ;;  %v366_v18 = vsub.s32 (%p203_p3), 6, %v251_v4  ;;  %v385_v20 = vsub.s32 (%p203_p3), 7, %v251_v4  ;;  %v223_v2 = vld [vmem:[#allocation4 + $0x60] sm:$0xff] (%p203_p3)  ;;  %s795_s2 = smov (%p203_p3), [#allocation10]  }
  0x5a   :  { %v291_v8 = vrot.slane %v209_v5, %v290_v6  ;;  %v272_v9 = vrot.slane %v209_v5, %v271_v7  ;;  %v253_v11 = vrot.slane %v209_v5, %v252_v10  ;;  %v310_v13 = vrot.slane %v209_v5, %v309_v12  ;;  %s606_s15 = sshll.u32 %s795_s2, 4  ;;  %s607_s15 = int_to_ptr.vmem [resolvable:$true] %s606_s15 }
  0x5b   :  { %v329_v15 = vrot.slane %v209_v5, %v328_v14  ;;  %v348_v17 = vrot.slane %v209_v5, %v347_v16  ;;  %v367_v19 = vrot.slane %v209_v5, %v366_v18  ;;  %v386_v21 = vrot.slane %v209_v5, %v385_v20  ;;  %v225_v5 = vld [vmem:[#allocation4 + $0x70] sm:$0xff]  ;;  %s741_s16 = scalar_lea.vmem %s607_s15, 128  ;;  %p746_p5 = scmp.lt.s32.totalorder %s607_s15, %s607_s15 }
  0x5c   :  { %293 = vbcast.lane.b32.xlu1 %v291_v8, 256  ;;  %274 = vbcast.lane.b32.xlu0 %v272_v9, 256  ;;  %vm597_vm9 = vcmask 269312   ;;  %p742_p4 = scmp.ne.s32.totalorder %s607_s15, %s741_s16  ;;  %p747_p6 = scmp.lt.s32.totalorder %s741_s16, %s741_s16 }
  0x5e   :  { %p748_p7 = por %p747_p6, %p746_p5 }
  0x60   :  { %297 = vbcast.lane.b32.xlu1 %v291_v8, 264  ;;  %278 = vbcast.lane.b32.xlu0 %v272_v9, 264  ;;  %p749_p8 = pnand %p748_p7, %p742_p4 }
  0x64   :  { %259 = vbcast.lane.b32.xlu1 %v253_v11, 264  ;;  %255 = vbcast.lane.b32.xlu0 %v253_v11, 256 }
  0x68   :  { %312 = vbcast.lane.b32.xlu1 %v310_v13, 256  ;;  %282 = vbcast.lane.b32.xlu0 %v272_v9, 272 }
  0x6c   :  { %301 = vbcast.lane.b32.xlu1 %v291_v8, 272  ;;  %316 = vbcast.lane.b32.xlu0 %v310_v13, 264 }
  0x70   :  { %335 = vbcast.lane.b32.xlu1 %v329_v15, 264  ;;  %331 = vbcast.lane.b32.xlu0 %v329_v15, 256 }
  0x74   :  { %286 = vbcast.lane.b32.xlu1 %v272_v9, 280  ;;  %263 = vbcast.lane.b32.xlu0 %v253_v11, 272 }
  0x78   :  { %350 = vbcast.lane.b32.xlu1 %v348_v17, 256  ;;  %320 = vbcast.lane.b32.xlu0 %v310_v13, 272 }
  0x7c   :  { %305 = vbcast.lane.b32.xlu1 %v291_v8, 280  ;;  %354 = vbcast.lane.b32.xlu0 %v348_v17, 264 }
  0x80   :  { %369 = vbcast.lane.b32.xlu1 %v367_v19, 256  ;;  %339 = vbcast.lane.b32.xlu0 %v329_v15, 272 }
  0x84   :  { %267 = vbcast.lane.b32.xlu1 %v253_v11, 280  ;;  %373 = vbcast.lane.b32.xlu0 %v367_v19, 264 }
  0x88   :  { %358 = vbcast.lane.b32.xlu1 %v348_v17, 272  ;;  %324 = vbcast.lane.b32.xlu0 %v310_v13, 280 }
  0x8c   :  { %392 = vbcast.lane.b32.xlu1 %v386_v21, 264  ;;  %388 = vbcast.lane.b32.xlu0 %v386_v21, 256 }
  0x90   :  { %377 = vbcast.lane.b32.xlu1 %v367_v19, 272  ;;  %343 = vbcast.lane.b32.xlu0 %v329_v15, 280  ;;  %v214_v15 = vld [vmem:[#allocation4 + $0x18] sm:$0xff] }
  0x94   :  { %396 = vbcast.lane.b32.xlu1 %v386_v21, 272  ;;  %362 = vbcast.lane.b32.xlu0 %v348_v17, 280 }
  0x98   :  { %400 = vbcast.lane.b32.xlu1 %v386_v21, 280  ;;  %381 = vbcast.lane.b32.xlu0 %v367_v19, 280 }
  0xb7   :  { %246 = vadd.xlane.f32.xlu0 %v245_v24 }
  0xce   :  { %v294_v25 = vpop.permute.xlu1 %293  ;;  %v275_v26 = vpop.permute.xlu0 %274 }
  0xcf   :  { %v406_v49 = vmul.f32 %v275_v26, %v215_v42  ;;  %v410_v0 = vmul.f32 %v294_v25, %v219_v54 }
  0xd1   :  { %v447_v1 = vsel %vm244_vm0, %v406_v49, 0.0  ;;  %v460_v20 = vsel %vm244_vm0, %v410_v0, 0.0 }
  0xd2   :  { %v298_v27 = vpop.permute.xlu1 %297  ;;  %v279_v28 = vpop.permute.xlu0 %278 }
  0xd3   :  { %v407_v44 = vmul.f32 %v279_v28, %v216_v39  ;;  %v411_v58 = vmul.f32 %v298_v27, %v220_v47  ;;  %v228_v27 = vld [vmem:[#allocation4 + $0x88] sm:$0xff] }
  0xd4   :  { %v232_v39 = vld [vmem:[#allocation4 + $0xa8] sm:$0xff] }
  0xd5   :  { %v448_v59 = vsel %vm244_vm0, %v407_v44, 0.0  ;;  %v461_v12 = vsel %vm244_vm0, %v411_v58, 0.0  ;;  %v229_v44 = vld [vmem:[#allocation4 + $0x90] sm:$0xff] }
  0xd6   :  { %v260_v29 = vpop.permute.xlu1 %259  ;;  %v256_v30 = vpop.permute.xlu0 %255  ;;  %v449_v8 = vadd.f32 %v448_v59, %v447_v1  ;;  %v462_v25 = vadd.f32 %v461_v12, %v460_v20  ;;  %v237_v20 = vld [vmem:[#allocation4 + $0xd0] sm:$0xff] }
  0xd7   :  { %v403_v55 = vmul.f32 %v260_v29, %v212_v45  ;;  %v402_v56 = vmul.f32 %v256_v30, %v211_v46  ;;  %v227_v30 = vld [vmem:[#allocation4 + $0x80] sm:$0xff] }
  0xd9   :  { %v435_v9 = vsel %vm244_vm0, %v403_v55, 0.0  ;;  %v434_v10 = vsel %vm244_vm0, %v402_v56, 0.0 }
  0xda   :  { %v313_v31 = vpop.permute.xlu1 %312  ;;  %v283_v32 = vpop.permute.xlu0 %282  ;;  %v436_v21 = vadd.f32 %v435_v9, %v434_v10  ;;  %v236_v10 = vld [vmem:[#allocation4 + $0xc8] sm:$0xff] }
  0xdb   :  { %v408_v50 = vmul.f32 %v283_v32, %v217_v43  ;;  %v414_v16 = vmul.f32 %v313_v31, %v223_v2 }
  0xdd   :  { %v450_v3 = vsel %vm244_vm0, %v408_v50, 0.0 }
  0xde   :  { %v302_v33 = vpop.permute.xlu1 %301  ;;  %v317_v34 = vpop.permute.xlu0 %316  ;;  %v451_v17 = vadd.f32 %v450_v3, %v449_v8  ;;  %v239_v3 = vld [vmem:[#allocation4 + $0xe0] sm:$0xff] }
  0xdf   :  { %v412_v4 = vmul.f32 %v302_v33, %v221_v57  ;;  %v415_v11 = vmul.f32 %v317_v34, %v224_v60  ;;  %v226_v33 = vld [vmem:[#allocation4 + $0x78] sm:$0xff]  ;;  %v473_v34 = vsel %vm244_vm0, %v414_v16, 0.0  ;;  %v233_v60 = vld [vmem:[#allocation4 + $0xb0] sm:$0xff] }
  0xe1   :  { %v463_v22 = vsel %vm244_vm0, %v412_v4, 0.0  ;;  %v474_v26 = vsel %vm244_vm0, %v415_v11, 0.0 }
  0xe2   :  { %v869_v35 = vpop.permute.xlu1 %335  ;;  %v871_v36 = vpop.permute.xlu0 %331  ;;  %v475_v42 = vadd.f32 %v474_v26, %v473_v34 }
  0xe3   :  { %v419_v43 = vmul.f32 %v869_v35, %v228_v27  ;;  %v241_v27 = vld [vmem:[#allocation4 + $0xf0] sm:$0xff] }
  0xe5   :  { %v487_v59 = vsel %vm244_vm0, %v419_v43, 0.0 }
  0xe6   :  { %v287_v37 = vpop.permute.xlu1 %286  ;;  %v264_v38 = vpop.permute.xlu0 %263 }
  0xe7   :  { %v409_v61 = vmul.f32 %v287_v37, %v218_v48  ;;  %v404_v62 = vmul.f32 %v264_v38, %v213_v51  ;;  %v464_v37 = vadd.f32 %v463_v22, %v462_v25  ;;  %v418_v48 = vmul.f32 %v871_v36, %v227_v30 }
  0xe9   :  { %v452_v13 = vsel %vm244_vm0, %v409_v61, 0.0  ;;  %v437_v18 = vsel %vm244_vm0, %v404_v62, 0.0  ;;  %v240_v61 = vld [vmem:[#allocation4 + $0xe8] sm:$0xff]  ;;  %v486_v0 = vsel %vm244_vm0, %v418_v48, 0.0  ;;  %v242_v48 = vld [vmem:[#allocation4 + $0xf8] sm:$0xff] }
  0xea   :  { %v873_v40 = vpop.permute.xlu1 %350  ;;  %v321_v41 = vpop.permute.xlu0 %320  ;;  %v453_v28 = vadd.f32 %v452_v13, %v451_v17  ;;  %v438_v31 = vadd.f32 %v437_v18, %v436_v21  ;;  %v488_v13 = vadd.f32 %v487_v59, %v486_v0  ;;  %v538_v0 = vld [vmem:[%s929_s6] sm:$0xff]  ;;  %s794_s6 = smov 1  }
  0xeb   :  { %v416_v19 = vmul.f32 %v321_v41, %v225_v5  ;;  %v230_v5 = vld [vmem:[#allocation4 + $0x98] sm:$0xff] }
  0xec   :  { %v454_v49 = vrot.slane %v453_v28, 4 }
  0xed   :  { %v476_v38 = vsel %vm244_vm0, %v416_v19, 0.0 }
  0xee   :  { %v306_v52 = vpop.permute.xlu1 %305  ;;  %v355_v53 = vpop.permute.xlu0 %354  ;;  %v477_v54 = vadd.f32 %v476_v38, %v475_v42  ;;  %v455_v36 = vadd.f32 %v454_v49, %v453_v28  ;;  %v234_v28 = vld [vmem:[#allocation4 + $0xb8] sm:$0xff] }
  0xef   :  { %v413_v14 = vmul.f32 %v306_v52, %v222_v63  ;;  %v231_v52 = vld [vmem:[#allocation4 + $0xa0] sm:$0xff]  ;;  %v423_v55 = vmul.f32 %v355_v53, %v232_v39  ;;  %v238_v49 = vld [vmem:[#allocation4 + $0xd8] sm:$0xff] }
  0xf0   :  { %v422_v1 = vmul.f32 %v873_v40, %v231_v52  ;;  %v456_v18 = vrot.slane %v455_v36, 2 }
  0xf1   :  { %v465_v32 = vsel %vm244_vm0, %v413_v14, 0.0  ;;  %v500_v53 = vsel %vm244_vm0, %v423_v55, 0.0 }
  0xf2   :  { %v878_v6 = vpop.permute.xlu1 %369  ;;  %v340_v7 = vpop.permute.xlu0 %339  ;;  %v466_v50 = vadd.f32 %v465_v32, %v464_v37  ;;  %v499_v40 = vsel %vm244_vm0, %v422_v1, 0.0 }
  0xf3   :  { %v420_v56 = vmul.f32 %v340_v7, %v229_v44  ;;  %v235_v7 = vld [vmem:[#allocation4 + $0xc0] sm:$0xff]  ;;  %v501_v22 = vadd.f32 %v500_v53, %v499_v40  ;;  %v541_v40 = vrot.slane %v538_v0, 2 }
  0xf4   :  { %v467_v2 = vrot.slane %v466_v50, 4 }
  0xf5   :  { %v489_v8 = vsel %vm244_vm0, %v420_v56, 0.0 }
  0xf6   :  { %v268_v23 = vpop.permute.xlu1 %267  ;;  %v887_v24 = vpop.permute.xlu0 %373  ;;  %v468_v19 = vadd.f32 %v467_v2, %v466_v50  ;;  %v490_v25 = vadd.f32 %v489_v8, %v488_v13 }
  0xf7   :  { %v405_v29 = vmul.f32 %v268_v23, %v214_v15  ;;  %v426_v23 = vmul.f32 %v878_v6, %v235_v7  ;;  %v427_v26 = vmul.f32 %v887_v24, %v236_v10  ;;  %v457_v6 = vadd.f32 %v456_v18, %v455_v36 }
  0xf8   :  { %v469_v42 = vrot.slane %v468_v19, 2 }
  0xf9   :  { %v439_v41 = vsel %vm244_vm0, %v405_v29, 0.0  ;;  %v512_v44 = vsel %vm244_vm0, %v426_v23, 0.0  ;;  %v458_v36 = vrot.slane %v457_v6, 1 }
  0xfa   :  { %v440_v45 = vadd.f32 %v439_v41, %v438_v31  ;;  %v359_v46 = vpop.permute.xlu1 %358  ;;  %v325_v47 = vpop.permute.xlu0 %324 }
  0xfb   :  { %v417_v51 = vmul.f32 %v325_v47, %v226_v33  ;;  %v424_v11 = vmul.f32 %v359_v46, %v233_v60 }
  0xfc   :  { %v441_v57 = vrot.slane %v440_v45, 4 }
  0xfd   :  { %v478_v58 = vsel %vm244_vm0, %v417_v51, 0.0  ;;  %v502_v30 = vsel %vm244_vm0, %v424_v11, 0.0 }
  0xfe   :  { %v479_v35 = vadd.f32 %v478_v58, %v477_v54  ;;  %v393_v62 = vpop.permute.xlu1 %392  ;;  %v389_v63 = vpop.permute.xlu0 %388  ;;  %v442_v9 = vadd.f32 %v441_v57, %v440_v45  ;;  %v513_v45 = vsel %vm244_vm0, %v427_v26, 0.0  ;;  %v503_v46 = vadd.f32 %v502_v30, %v501_v22 }
  0xff   :  { %v431_v12 = vmul.f32 %v393_v62, %v240_v61  ;;  %v430_v15 = vmul.f32 %v389_v63, %v239_v3  ;;  %v514_v61 = vadd.f32 %v513_v45, %v512_v44  ;;  %v546_v45 = vrot.slane %v538_v0, 7 }
 0x100   :  { %v480_v4 = vrot.slane %v479_v35, 4  ;;  %v443_v29 = vrot.slane %v442_v9, 2 }
 0x101   :  { %v526_v31 = vsel %vm244_vm0, %v431_v12, 0.0  ;;  %v525_v34 = vsel %vm244_vm0, %v430_v15, 0.0  ;;  %v540_v12 = vrot.slane %v538_v0, 1  ;;  %v459_v15 = vadd.f32 %v458_v36, %v457_v6 }
 0x102   :  { %v481_v14 = vadd.f32 %v480_v4, %v479_v35  ;;  %v378_v16 = vpop.permute.xlu1 %377  ;;  %v344_v17 = vpop.permute.xlu0 %343  ;;  %v444_v50 = vadd.f32 %v443_v29, %v442_v9  ;;  %v527_v51 = vadd.f32 %v526_v31, %v525_v34  ;;  %v470_v35 = vadd.f32 %v469_v42, %v468_v19 }
 0x103   :  { %v421_v21 = vmul.f32 %v344_v17, %v230_v5  ;;  %v428_v37 = vmul.f32 %v378_v16, %v237_v20  ;;  %v542_v19 = vrot.slane %v538_v0, 3  ;;  %v556_v30 = vadd.f32 %v540_v12, %v459_v15 }
 0x104   :  { %v482_v33 = vrot.slane %v481_v14, 2  ;;  %v445_v53 = vrot.slane %v444_v50, 1  ;;  %v471_v13 = vrot.slane %v470_v35, 1 }
 0x105   :  { %v491_v32 = vsel %vm244_vm0, %v421_v21, 0.0  ;;  %v515_v56 = vsel %vm244_vm0, %v428_v37, 0.0 }
 0x106   :  { %v492_v38 = vadd.f32 %v491_v32, %v490_v25  ;;  %v397_v39 = vpop.permute.xlu1 %396  ;;  %v363_v41 = vpop.permute.xlu0 %362  ;;  %v483_v55 = vadd.f32 %v482_v33, %v481_v14  ;;  %v516_v4 = vadd.f32 %v515_v56, %v514_v61  ;;  %v446_v21 = vadd.f32 %v445_v53, %v444_v50 }
 0x107   :  { %v432_v43 = vmul.f32 %v397_v39, %v241_v27  ;;  %v425_v24 = vmul.f32 %v363_v41, %v234_v28  ;;  %v472_v26 = vadd.f32 %v471_v13, %v470_v35  ;;  %v543_v27 = vrot.slane %v538_v0, 4 }
 0x108   :  { %v493_v47 = vrot.slane %v492_v38, 4  ;;  %v484_v8 = vrot.slane %v483_v55, 1  ;;  %v544_v33 = vrot.slane %v538_v0, 5  ;;  %v555_v37 = vadd.f32 %v538_v0, %v446_v21 }
 0x109   :  { %v528_v52 = vsel %vm244_vm0, %v432_v43, 0.0  ;;  %v504_v54 = vsel %vm244_vm0, %v425_v24, 0.0  ;;  %v557_v6 = vadd.f32 %v541_v40, %v472_v26  ;;  %v571_v24 = vrot.slane %v556_v30, 7 }
 0x10a   :  { %v494_v57 = vadd.f32 %v493_v47, %v492_v38  ;;  %v505_v58 = vadd.f32 %v504_v54, %v503_v46  ;;  %v401_v59 = vpop.permute.xlu1 %400  ;;  %v382_v60 = vpop.permute.xlu0 %381  ;;  %v529_v2 = vadd.f32 %v528_v52, %v527_v51  ;;  %v485_v22 = vadd.f32 %v484_v8, %v483_v55 }
 0x10b   :  { %v433_v62 = vmul.f32 %v401_v59, %v242_v48  ;;  %v429_v63 = vmul.f32 %v382_v60, %v238_v49  ;;  %v545_v48 = vrot.slane %v538_v0, 6  ;;  %v573_v51 = vsel %vm572_vm1, %v571_v24, %v555_v37 }
 0x10c   :  { %v495_v1 = vrot.slane %v494_v57, 2  ;;  %v506_v3 = vrot.slane %v505_v58, 4  ;;  %v558_v38 = vadd.f32 %v542_v19, %v485_v22  ;;  %v574_v52 = vrot.slane %v557_v6, 6 }
 0x10d   :  { %v530_v5 = vsel %vm244_vm0, %v433_v62, 0.0  ;;  %v517_v7 = vsel %vm244_vm0, %v429_v63, 0.0 }
 0x10e   :  { %v496_v9 = vadd.f32 %v495_v1, %v494_v57  ;;  %v507_v10 = vadd.f32 %v506_v3, %v505_v58  ;;  %v531_v11 = vadd.f32 %v530_v5, %v529_v2  ;;  %v518_v14 = vadd.f32 %v517_v7, %v516_v4  ;;  %v248_v1 = vld [vmem:[%s928_s5] sm:$0xff] }
 0x10f   :  { %v577_v49 = vrot.slane %v558_v38, 5  ;;  %v576_v59 = vsel %vm575_vm2, %v574_v52, %v573_v51 }
 0x110   :  { %v497_v16 = vrot.slane %v496_v9, 1  ;;  %v508_v17 = vrot.slane %v507_v10, 2  ;;  %v532_v18 = vrot.slane %v531_v11, 4  ;;  %v519_v20 = vrot.slane %v518_v14, 4 }
 0x111   :  { %v579_v60 = vsel %vm578_vm3, %v577_v49, %v576_v59 }
 0x112   :  { %v509_v23 = vadd.f32 %v508_v17, %v507_v10  ;;  %v533_v25 = vadd.f32 %v532_v18, %v531_v11  ;;  %v498_v28 = vadd.f32 %v497_v16, %v496_v9  ;;  %v520_v29 = vadd.f32 %v519_v20, %v518_v14 }
 0x114   :  { %v510_v31 = vrot.slane %v509_v23, 1  ;;  %v534_v32 = vrot.slane %v533_v25, 2  ;;  %v521_v34 = vrot.slane %v520_v29, 2  ;;  %v559_v42 = vadd.f32 %v543_v27, %v498_v28 }
 0x116   :  { %v511_v39 = vadd.f32 %v510_v31, %v509_v23  ;;  %v535_v41 = vadd.f32 %v534_v32, %v533_v25  ;;  %v522_v43 = vadd.f32 %v521_v34, %v520_v29  ;;  %v580_v54 = vrot.slane %v559_v42, 4 }
 0x118   :  { %v536_v44 = vrot.slane %v535_v41, 1  ;;  %v560_v46 = vadd.f32 %v544_v33, %v511_v39  ;;  %v523_v47 = vrot.slane %v522_v43, 1  ;;  %v582_v61 = vsel %vm581_vm4, %v580_v54, %v579_v60 }
 0x11a   :  { %v537_v50 = vadd.f32 %v536_v44, %v535_v41  ;;  %v524_v55 = vadd.f32 %v523_v47, %v522_v43  ;;  %v583_v57 = vrot.slane %v560_v46, 3 }
 0x11c   :  { %v562_v56 = vadd.f32 %v546_v45, %v537_v50  ;;  %v561_v58 = vadd.f32 %v545_v48, %v524_v55  ;;  %v585_v63 = vsel %vm584_vm5, %v583_v57, %v582_v61 }
 0x11e   :  { %v589_v35 = vrot.slane %v562_v56, 1  ;;  %v586_v62 = vrot.slane %v561_v58, 2 }
 0x120   :  { %v588_v0 = vsel %vm587_vm6, %v586_v62, %v585_v63 }
 0x121   :  { %v591_v36 = vsel %vm590_vm7, %v589_v35, %v588_v0 }
 0x122   :  { %592 = vrot.lane.b32.xlu1 %v591_v36, %s794_s6 }
 0x140   :  { %v247_v2 = vpop.xlane.xlu0 %246 }
 0x141   :  { %v249_v3 = vadd.f32 %v248_v1, %v247_v2 }
 0x194   :  { %v593_v53 = vpop.permute.xlu1 %592 }
 0x195   :  { %v596_v4 = vsel %vm595_vm8, %v249_v3, %v593_v53 }
 0x196   :  { %v598_v5 = vsel %vm597_vm9, %v596_v4, 0.0 }
 0x197   :  { %599 = vst [vmem:[#allocation10] sm:$0xff] %v598_v5 }
 0x198   :  { %752 = shalt.err (!%p749_p8)
}
 0x199   :  { %609 = dma.vmem_to_hbm [thread:$0]  %s607_s15, 128, %s930_s7, [#allocation11]  }
 0x19a   :  { %777 = dma.done.wait [#allocation11], 128  }
 0x19b   :  { %778 = vsyncadd [#allocation11], 4294967168 }
 0x19c   :  { %613 = vsyncpa [#allocation11], 1 }
 0x19d   :  { %614 = vsyncmov [#allocation5] }
 0x1a0   :  { %s615_s18 = vpop.sfrf %614 }
 0x1a1   :  { %p675_p9 = scmp.ne.s32.totalorder %s615_s18, 0 }
 0x1a3   :  { %619 = shalt.err (%p675_p9)  }

</bundles_post_ra>
